<compile_context>
chip_gen: v7x
topology: tpu7x:2x2x1
jax: 0.10.0
libtpu: 0.0.40
codegen_flags: <defaults>
</compile_context>

<pallas_src>
import functools

import jax
import jax.numpy as jnp
from jax.experimental import pallas as pl
from jax.experimental.pallas import tpu as pltpu

_EPS = 1e-6  # F.pairwise_distance default eps


def _contrastive_partial_kernel(alpha_ref, out1_ref, vecs_ref, feat1_ref,
                                part_ref, *, n_rows, tile, nt, needs_mask):
    """Per-core partial sum of pairwise distances.

    alpha_ref : (1,)        f32 SMEM  scalar-prefetch  [alpha]
    out1_ref  : (1, D)      f32 VMEM  (resident across the grid)
    vecs_ref  : (tile, D)   f32 VMEM  (row tile of the stacked comparison vectors)
    feat1_ref : (1, D)      f32 VMEM  (resident across the grid)
    part_ref  : (1, 8, 128) f32 VMEM  per-core partial sum (element [0,0,0] read back)
    """
    c = pl.program_id(0)          # core axis ("parallel")
    t = pl.program_id(1)          # row-tile axis ("arbitrary", output stays resident)

    @pl.when(t == 0)
    def _init():
        part_ref[...] = jnp.zeros_like(part_ref)

    # pairwise_distance(output1, v_i) = || output1 - v_i + eps ||_2 per row.
    diff = out1_ref[...] - vecs_ref[...] + _EPS                       # (tile, D)
    dists = jnp.sqrt(jnp.sum(diff * diff, axis=-1, keepdims=True))    # (tile, 1)

    g = c * nt + t                # global row-block index (may point past real blocks)
    if needs_mask:
        @pl.when(g * tile + tile <= n_rows)       # fully valid tile: plain add
        def _full():
            part_ref[...] += jnp.sum(dists)

        @pl.when(g * tile + tile > n_rows)        # ragged / empty trailing tile
        def _ragged():
            n_valid = jnp.clip(n_rows - g * tile, 0, tile)
            row_ids = jax.lax.broadcasted_iota(jnp.int32, (tile, 1), 0)
            # jnp.where is a select: stale/garbage rows never feed the reduction.
            part_ref[...] += jnp.sum(jnp.where(row_ids < n_valid, dists, 0.0))
    else:
        part_ref[...] += jnp.sum(dists)

    # alpha * ||output1 - feat1 + eps||_2 is folded into core 0's partial sum.
    @pl.when(jnp.logical_and(c == 0, t == nt - 1))
    def _feat():
        dfeat = out1_ref[...] - feat1_ref[...] + _EPS
        part_ref[...] += alpha_ref[0] * jnp.sqrt(jnp.sum(dfeat * dfeat))


def _stack_vectors(vectors):
    """Accept a list of (1, D) arrays (torch-style) or a pre-stacked (N, D) array."""
    if isinstance(vectors, (list, tuple)):
        return jnp.stack(
            [jnp.asarray(v, jnp.float32).reshape(-1) for v in vectors], axis=0)
    v = jnp.asarray(vectors, jnp.float32)
    return v.reshape(v.shape[0], -1)


def _tile_plan(d, max_tile_rows):
    """Pick (max_rows_per_tile, vmem_limit_bytes), generation-aware and lane-padding aware."""
    try:
        vmem_cap = int(getattr(pltpu.get_tpu_info(), "vmem_capacity_bytes", 64 << 20))
    except Exception:                                   # conservative fallback
        vmem_cap = 64 << 20
    if vmem_cap <= (64 << 20):
        # v7x-class: 64 MiB VMEM but ~3.2 TB/s HBM -> big tiles hide the ~0.35us/step cost.
        target_bytes, vmem_limit = 8 << 20, 32 << 20
    else:
        # v5e / v6e: 128 MiB physical VMEM; ~4 MiB tiles already sit at the HBM roofline.
        target_bytes, vmem_limit = 4 << 20, 64 << 20
    padded_d = ((d + 127) // 128) * 128                 # lane-padded VMEM row footprint
    rows = max(8, (target_bytes // (4 * padded_d)) // 8 * 8)
    if max_tile_rows is not None:
        rows = max(8, min(rows, (int(max_tile_rows) // 8) * 8))
    return rows, vmem_limit


def contrastive_loss(output1, vectors, feat1, label, alpha,
                     v=0.0, margin=0.8, max_tile_rows=None):
    """Pallas TPU implementation of ContrastiveLoss.forward (B=1).

    output1: (1, D) f32
    vectors: pre-stacked (N, D) f32 array (preferred) or list of (1, D) arrays
    feat1:   (1, D) f32
    label, alpha: scalars (python or traced)
    v, margin: static module configuration (a traced `v` is not supported)
    max_tile_rows: optional cap on the row tile (testing / VMEM control)
    Returns: (1,) f32 loss (same shape as the torch module's output).
    """
    output1 = jnp.asarray(output1, jnp.float32).reshape(1, -1)
    feat1 = jnp.asarray(feat1, jnp.float32).reshape(1, -1)
    vecs = _stack_vectors(vectors)
    n, d = vecs.shape

    alpha = jnp.asarray(alpha, jnp.float32).reshape(())
    label = jnp.asarray(label, jnp.float32).reshape(())

    max_rows, vmem_limit = _tile_plan(d, max_tile_rows)
    if n <= max_rows:
        tile, n_blocks = n, 1
    else:
        tile, n_blocks = max_rows, pl.cdiv(n, max_rows)

    num_cores = 2 if n_blocks >= 2 else 1      # split row blocks across v7x's 2 TCs
    nt = pl.cdiv(n_blocks, num_cores)
    needs_mask = (num_cores * nt * tile) != n
    last_block = n_blocks - 1

    def vecs_index(c, t, _alpha):
        # Clamp so a (rare) fully-empty trailing block re-reads the last real block;
        # its rows are masked out in-kernel, so the data content is irrelevant.
        return (jnp.minimum(c * nt + t, last_block), 0)

    kernel = functools.partial(_contrastive_partial_kernel,
                               n_rows=n, tile=tile, nt=nt, needs_mask=needs_mask)

    grid_spec = pltpu.PrefetchScalarGridSpec(
        num_scalar_prefetch=1,
        grid=(num_cores, nt),
        in_specs=[
            pl.BlockSpec((1, d), lambda c, t, _a: (0, 0)),       # output1 (resident)
            pl.BlockSpec((tile, d), vecs_index),                 # stacked vectors (streamed)
            pl.BlockSpec((1, d), lambda c, t, _a: (0, 0)),       # feat1   (resident)
        ],
        out_specs=pl.BlockSpec((1, 8, 128), lambda c, t, _a: (c, 0, 0)),
    )

    partials = pl.pallas_call(
        kernel,
        out_shape=jax.ShapeDtypeStruct((num_cores, 8, 128), jnp.float32),
        grid_spec=grid_spec,
        compiler_params=pltpu.CompilerParams(
            dimension_semantics=("parallel", "arbitrary"),
            vmem_limit_bytes=vmem_limit),
        cost_estimate=pl.CostEstimate(
            flops=3 * n * d,
            transcendentals=n + 1,
            bytes_accessed=4 * (n * d + 2 * d + num_cores * 8 * 128)),
    )(alpha.reshape(1), output1, vecs, feat1)

    # Combine the per-core partial sums and finish the scalar tail (tiny XLA ops).
    dist_sum = jnp.sum(partials[:, 0, 0])
    ed = dist_sum / jnp.sqrt(jnp.float32(d))
    if float(v) > 0.0:                         # static module config (traced v unsupported)
        ed = ed / jnp.float32(v)
    marg = (jnp.float32(n) + alpha) * jnp.float32(margin)
    hinge = jnp.maximum(jnp.float32(0.0), marg - ed)
    loss = (1.0 - label) * ed * ed * 0.5 + label * hinge * hinge * 0.5
    return loss.reshape(1)


def _reference_loss(output1, vecs, feat1, label, alpha, v=0.0, margin=0.8):
    # Pure-JAX mirror of the torch forward, for a correctness check.
    output1 = jnp.asarray(output1, jnp.float32).reshape(1, -1)
    vecs = jnp.asarray(vecs, jnp.float32)
    feat1 = jnp.asarray(feat1, jnp.float32).reshape(1, -1)
    d = output1.shape[1]
    sqrt_d = jnp.sqrt(jnp.float32(d))
    dists = jnp.sqrt(jnp.sum((output1 - vecs + _EPS) ** 2, axis=1)) / sqrt_d
    ed = jnp.sum(dists)
    ed = ed + alpha * (jnp.sqrt(jnp.sum((output1 - feat1 + _EPS) ** 2)) / sqrt_d)
    if v > 0.0:
        ed = ed / v
    marg = (vecs.shape[0] + alpha) * margin
    hinge = jnp.maximum(0.0, marg - ed)
    return jnp.reshape((1 - label) * ed ** 2 * 0.5 + label * hinge ** 2 * 0.5, (1,))


if __name__ == "__main__":
    key = jax.random.PRNGKey(0)

    # --- small case matching the torch module's usage (B=1, a handful of vectors) ---
    B, D, N = 1, 32, 4
    k0, k1, k2 = jax.random.split(key, 3)
    output1 = jax.random.normal(k0, (B, D), dtype=jnp.float32)
    vectors = jax.random.normal(k1, (N, D), dtype=jnp.float32)  # pre-stacked (N, D)
    feat1 = jax.random.normal(k2, (B, D), dtype=jnp.float32)

    cases = [
        dict(label=1.0, alpha=0.5, v=0.0, margin=2.5),   # hinge branch (nonzero)
        dict(label=0.0, alpha=0.5, v=2.0, margin=0.8),   # ed^2 branch + 1/v scaling
    ]
    for c in cases:
        loss = jax.block_until_ready(
            contrastive_loss(output1, vectors, feat1, c["label"], c["alpha"],
                             v=c["v"], margin=c["margin"]))
        ref = _reference_loss(output1, vectors, feat1, c["label"], c["alpha"],
                              v=c["v"], margin=c["margin"])
        assert loss.shape == (1,)
        assert jnp.allclose(loss, ref, rtol=1e-5, atol=1e-5), (c, loss, ref)

    # --- larger N: exercises row tiling, the 2-core split and ragged-row masking ---
    # N=200, tile=64 -> 4 row blocks (ragged last); N=150 -> 3 blocks (+1 empty block).
    for N2 in (200, 150):
        D2 = 128
        k3, k4, k5 = jax.random.split(jax.random.PRNGKey(N2), 3)
        output1b = jax.random.normal(k3, (1, D2), dtype=jnp.float32)
        vectorsb = jax.random.normal(k4, (N2, D2), dtype=jnp.float32)
        feat1b = jax.random.normal(k5, (1, D2), dtype=jnp.float32)

        lossb = jax.block_until_ready(
            contrastive_loss(output1b, vectorsb, feat1b, 0.0, 0.3,
                             v=0.0, margin=0.8, max_tile_rows=64))
        refb = _reference_loss(output1b, vectorsb, feat1b, 0.0, 0.3,
                               v=0.0, margin=0.8)
        assert jnp.allclose(lossb, refb, rtol=1e-4, atol=1e-4), (N2, lossb, refb)

    print("KERNEL_OK")
</pallas_src>

<mosaic_0001>
module attributes {stable_mosaic.version = 11 : i64} {
  func.func @_contrastive_partial_kernel(%arg0: i32, %arg1: i32, %arg2: memref<1xf32, #tpu.memory_space<smem>>, %arg3: memref<1x32xf32, #tpu.memory_space<vmem>>, %arg4: memref<4x32xf32, #tpu.memory_space<vmem>>, %arg5: memref<1x32xf32, #tpu.memory_space<vmem>>, %arg6: memref<1x8x128xf32, #tpu.memory_space<vmem>>) attributes {dimension_semantics = [#tpu.dimension_semantics<parallel>, #tpu.dimension_semantics<arbitrary>], iteration_bounds = array<i64: 1, 1>, scalar_prefetch = 1 : i64, scratch_operands = 0 : i64, tpu.core_type = #tpu.core_type<tc>, window_params = [{pipeline_mode = #tpu.pipeline_mode<synchronous>, transform_indices = @transform_0, window_bounds = array<i64: 1, 32>}, {transform_indices = @transform_1, window_bounds = array<i64: 4, 32>}, {pipeline_mode = #tpu.pipeline_mode<synchronous>, transform_indices = @transform_2, window_bounds = array<i64: 1, 32>}, {transform_indices = @transform_3, window_bounds = array<i64: 1, 8, 128>}]} {
    %c0_i32 = arith.constant 0 : i32
    %0 = arith.cmpi eq, %arg1, %c0_i32 : i32
    %1 = arith.extui %0 : i1 to i32
    %c0_i32_0 = arith.constant 0 : i32
    %2 = arith.cmpi ne, %1, %c0_i32_0 : i32
    scf.if %2 {
      %cst_15 = arith.constant 0.000000e+00 : f32
      %26 = vector.broadcast %cst_15 : f32 to vector<1x8x128xf32>
      %c0_16 = arith.constant 0 : index
      %c0_17 = arith.constant 0 : index
      %c0_18 = arith.constant 0 : index
      %27 = vector.load %arg6[%c0_16, %c0_17, %c0_18] : memref<1x8x128xf32, #tpu.memory_space<vmem>>, vector<1x8x128xf32>
      tpu.vector_store %arg6[%c0_16, %c0_17, %c0_18], %26 {strides = array<i32>} : memref<1x8x128xf32, #tpu.memory_space<vmem>>, vector<1x8x128xf32>,
    } else {
    }
    %c0 = arith.constant 0 : index
    %c0_1 = arith.constant 0 : index
    %3 = vector.load %arg3[%c0, %c0_1] : memref<1x32xf32, #tpu.memory_space<vmem>>, vector<1x32xf32>
    %c0_2 = arith.constant 0 : index
    %c0_3 = arith.constant 0 : index
    %4 = vector.load %arg4[%c0_2, %c0_3] : memref<4x32xf32, #tpu.memory_space<vmem>>, vector<4x32xf32>
    %5 = vector.broadcast %3 : vector<1x32xf32> to vector<4x32xf32>
    %6 = arith.subf %5, %4 : vector<4x32xf32>
    %cst = arith.constant 9.99999997E-7 : f32
    %7 = vector.broadcast %cst : f32 to vector<4x32xf32>
    %8 = arith.addf %6, %7 : vector<4x32xf32>
    %9 = arith.mulf %8, %8 : vector<4x32xf32>
    %cst_4 = arith.constant dense<0.000000e+00> : vector<4xf32>
    %10 = vector.multi_reduction <add>, %9, %cst_4 [1] : vector<4x32xf32> to vector<4xf32>
    %11 = vector.shape_cast %10 : vector<4xf32> to vector<4x1xf32>
    %12 = math.sqrt %11 : vector<4x1xf32>
    %c0_5 = arith.constant 0 : index
    %c0_6 = arith.constant 0 : index
    %c0_7 = arith.constant 0 : index
    %13 = vector.load %arg6[%c0_5, %c0_6, %c0_7] : memref<1x8x128xf32, #tpu.memory_space<vmem>>, vector<1x8x128xf32>
    %14 = vector.shape_cast %12 : vector<4x1xf32> to vector<1x4x1xf32>
    %cst_8 = arith.constant dense<0.000000e+00> : vector<1xf32>
    %15 = vector.multi_reduction <add>, %14, %cst_8 [1, 2] : vector<1x4x1xf32> to vector<1xf32>
    %16 = vector.shape_cast %15 : vector<1xf32> to vector<1x1x1xf32>
    %17 = vector.extract %16[0, 0, 0] : f32 from vector<1x1x1xf32>
    %18 = vector.broadcast %17 : f32 to vector<1x8x128xf32>
    %19 = arith.addf %13, %18 : vector<1x8x128xf32>
    %c0_9 = arith.constant 0 : index
    %c0_10 = arith.constant 0 : index
    %c0_11 = arith.constant 0 : index
    %20 = vector.load %arg6[%c0_9, %c0_10, %c0_11] : memref<1x8x128xf32, #tpu.memory_space<vmem>>, vector<1x8x128xf32>
    tpu.vector_store %arg6[%c0_9, %c0_10, %c0_11], %19 {strides = array<i32>} : memref<1x8x128xf32, #tpu.memory_space<vmem>>, vector<1x8x128xf32>,
    %c0_i32_12 = arith.constant 0 : i32
    %21 = arith.cmpi eq, %arg0, %c0_i32_12 : i32
    %c0_i32_13 = arith.constant 0 : i32
    %22 = arith.cmpi eq, %arg1, %c0_i32_13 : i32
    %23 = arith.andi %21, %22 : i1
    %24 = arith.extui %23 : i1 to i32
    %c0_i32_14 = arith.constant 0 : i32
    %25 = arith.cmpi ne, %24, %c0_i32_14 : i32
    scf.if %25 {
      %c0_15 = arith.constant 0 : index
      %c0_16 = arith.constant 0 : index
      %26 = vector.load %arg3[%c0_15, %c0_16] : memref<1x32xf32, #tpu.memory_space<vmem>>, vector<1x32xf32>
      %c0_17 = arith.constant 0 : index
      %c0_18 = arith.constant 0 : index
      %27 = vector.load %arg5[%c0_17, %c0_18] : memref<1x32xf32, #tpu.memory_space<vmem>>, vector<1x32xf32>
      %28 = arith.subf %26, %27 : vector<1x32xf32>
      %cst_19 = arith.constant 9.99999997E-7 : f32
      %29 = vector.broadcast %cst_19 : f32 to vector<1x32xf32>
      %30 = arith.addf %28, %29 : vector<1x32xf32>
      %c0_20 = arith.constant 0 : index
      %c0_21 = arith.constant 0 : index
      %c0_22 = arith.constant 0 : index
      %31 = vector.load %arg6[%c0_20, %c0_21, %c0_22] : memref<1x8x128xf32, #tpu.memory_space<vmem>>, vector<1x8x128xf32>
      %c0_23 = arith.constant 0 : index
      %32 = memref.load %arg2[%c0_23] : memref<1xf32, #tpu.memory_space<smem>>
      %33 = arith.mulf %30, %30 : vector<1x32xf32>
      %34 = vector.shape_cast %33 : vector<1x32xf32> to vector<1x1x32xf32>
      %cst_24 = arith.constant dense<0.000000e+00> : vector<1xf32>
      %35 = vector.multi_reduction <add>, %34, %cst_24 [1, 2] : vector<1x1x32xf32> to vector<1xf32>
      %36 = vector.shape_cast %35 : vector<1xf32> to vector<1x1x1xf32>
      %37 = vector.extract %36[0, 0, 0] : f32 from vector<1x1x1xf32>
      %38 = math.sqrt %37 : f32
      %39 = arith.mulf %32, %38 : f32
      %40 = vector.broadcast %39 : f32 to vector<1x8x128xf32>
      %41 = arith.addf %31, %40 : vector<1x8x128xf32>
      %c0_25 = arith.constant 0 : index
      %c0_26 = arith.constant 0 : index
      %c0_27 = arith.constant 0 : index
      %42 = vector.load %arg6[%c0_25, %c0_26, %c0_27] : memref<1x8x128xf32, #tpu.memory_space<vmem>>, vector<1x8x128xf32>
      tpu.vector_store %arg6[%c0_25, %c0_26, %c0_27], %41 {strides = array<i32>} : memref<1x8x128xf32, #tpu.memory_space<vmem>>, vector<1x8x128xf32>,
    } else {
    }
    return
  }
  func.func @transform_0(%arg0: i32, %arg1: i32, %arg2: memref<1xf32, #tpu.memory_space<smem>>) -> (i32, i32) {
    %c0_i32 = arith.constant 0 : i32
    %c0_i32_0 = arith.constant 0 : i32
    %c0_i32_1 = arith.constant 0 : i32
    return %c0_i32, %c0_i32_0 : i32, i32
  }
  func.func @transform_1(%arg0: i32, %arg1: i32, %arg2: memref<1xf32, #tpu.memory_space<smem>>) -> (i32, i32) {
    %c1_i32 = arith.constant 1 : i32
    %0 = arith.muli %arg0, %c1_i32 : i32
    %1 = arith.addi %0, %arg1 : i32
    %c0_i32 = arith.constant 0 : i32
    %2 = arith.minsi %1, %c0_i32 : i32
    %c0_i32_0 = arith.constant 0 : i32
    %c0_i32_1 = arith.constant 0 : i32
    return %2, %c0_i32_0 : i32, i32
  }
  func.func @transform_2(%arg0: i32, %arg1: i32, %arg2: memref<1xf32, #tpu.memory_space<smem>>) -> (i32, i32) {
    %c0_i32 = arith.constant 0 : i32
    %c0_i32_0 = arith.constant 0 : i32
    %c0_i32_1 = arith.constant 0 : i32
    return %c0_i32, %c0_i32_0 : i32, i32
  }
  func.func @transform_3(%arg0: i32, %arg1: i32, %arg2: memref<1xf32, #tpu.memory_space<smem>>) -> (i32, i32, i32) {
    %c0_i32 = arith.constant 0 : i32
    %c0_i32_0 = arith.constant 0 : i32
    %c0_i32_1 = arith.constant 0 : i32
    return %arg0, %c0_i32, %c0_i32_0 : i32, i32, i32
  }
}

</mosaic_0001>

<bundles_post_ra>
// kernel: tpu_custom_call.1
= control target key start
LH: loop header
LB: loop body
LE: loop exit
PB: predicated region body
PF: predicated region fallthrough
CT: control target
= control target key end

     0   :  { %s232_s0 = inlined_call_operand.<no memory space> [shape: f32[1], index: 0, kind: input, shape index: {}]   ;;  %s233_s1 = inlined_call_operand.vmem [shape: f32[1,32], index: 1, kind: input, shape index: {}]   ;;  %s234_s2 = inlined_call_operand.vmem [shape: f32[4,32], index: 2, kind: input, shape index: {}]   ;;  %s235_s3 = inlined_call_operand.vmem [shape: f32[1,32], index: 3, kind: input, shape index: {}]   ;;  %s236_s4 = inlined_call_operand.hbm [shape: f32[1,8,128], index: 4, kind: output, shape index: {}]  }
   0x1   :  { %v142_v0 = vld [vmem:[%s233_s1] ss:$0 sm:$0xff] }
   0x2   :  { %v50_v1 = vld [vmem:[%s234_s2] sm:$0xf] }
   0x3   :  { %v57_v2 = vsub.f32 %v142_v0, %v50_v1 }
   0x4   :  { %10 = vsyncpa [#allocation5], 0  ;;  %vm60_vm0 = vcmask 257024   ;;  %v91_v6 = vld [vmem:[%s233_s1] sm:$0x1]  ;;  %vm98_vm1 = vcmask 253952  }
   0x5   :  { %v58_v3 = vadd.f32 1e-06, %v57_v2  ;;  %v92_v7 = vld [vmem:[%s235_s3] sm:$0x1]  ;;  %vm72_vm3 = vcmask 3072   ;;  %s179_s26 = smov [#allocation4]  }
   0x6   :  { %v93_v8 = vsub.f32 %v91_v6, %v92_v7  ;;  %s128_s27 = sshll.u32 %s179_s26, 4  ;;  %s129_s27 = int_to_ptr.vmem [resolvable:$true] %s128_s27 }
   0x7   :  { %v59_v4 = vmul.f32 %v58_v3, %v58_v3  ;;  %s155_s28 = scalar_lea.vmem %s129_s27, 128  ;;  %p160_p1 = scmp.lt.s32.totalorder %s129_s27, %s129_s27 }
   0x8   :  { %v94_v9 = vadd.f32 1e-06, %v93_v8  ;;  %p156_p0 = scmp.ne.s32.totalorder %s129_s27, %s155_s28  ;;  %p161_p2 = scmp.lt.s32.totalorder %s155_s28, %s155_s28 }
   0x9   :  { %v61_v5 = vsel %vm60_vm0, %v59_v4, 0.0 }
   0xa   :  { %62 = vadd.xlane.f32.xlu0 %v61_v5  ;;  %v97_v10 = vmul.f32 %v94_v9, %v94_v9  ;;  %p162_p3 = por %p161_p2, %p160_p1 }
   0xc   :  { %v99_v11 = vsel %vm98_vm1, %v97_v10, 0.0  ;;  %p163_p4 = pnand %p162_p3, %p156_p0 }
   0xd   :  { %100 = vadd.xlane.f32.xlu1 %v99_v11 }
  0x97   :  { %v63_v12 = vpop.xlane.xlu0 %62 }
  0x98   :  { %151 = vrsqrt.f32 %v63_v12  ;;  %vm66_vm2 = vcmp.eq.f32.partialorder %v63_v12, inf  ;;  %v69_v15 = vand.u32 2147483648, %v63_v12  ;;  %vm68_vm4 = vcmp.eq.f32.partialorder %v63_v12, 0.0 }
  0x9a   :  { %v101_v19 = vpop.xlane.xlu1 %100 }
  0x9b   :  { %v102_v20 = vrot.slane %v101_v19, 4 }
  0x9d   :  { %v103_v21 = vadd.f32 %v102_v20, %v101_v19 }
  0x9f   :  { %v104_v22 = vrot.slane %v103_v21, 2 }
  0xa1   :  { %v105_v26 = vadd.f32 %v104_v22, %v103_v21 }
  0xa2   :  { %v152_v13 = vpop.eup %151 }
  0xa3   :  { %v65_v14 = vmul.f32 %v152_v13, %v63_v12  ;;  %v106_v29 = vrot.slane %v105_v26, 1 }
  0xa5   :  { %v67_v16 = vsel %vm66_vm2, %v63_v12, %v65_v14  ;;  %v107_v32 = vadd.f32 %v106_v29, %v105_v26 }
  0xa6   :  { %v70_v17 = vsel %vm68_vm4, %v69_v15, %v67_v16 }
  0xa7   :  { %v73_v18 = vsel %vm72_vm3, %v70_v17, 0.0 }
  0xa8   :  { %74 = vadd.xlane.f32.xlu0 %v73_v18 }
 0x135   :  { %v75_v23 = vpop.xlane.xlu0 %74 }
 0x136   :  { %v76_v24 = vrot.slane %v75_v23, 4 }
 0x138   :  { %v77_v25 = vadd.f32 %v76_v24, %v75_v23 }
 0x13a   :  { %v78_v27 = vrot.slane %v77_v25, 2 }
 0x13c   :  { %v79_v28 = vadd.f32 %v78_v27, %v77_v25 }
 0x13e   :  { %v80_v30 = vrot.slane %v79_v28, 1 }
 0x140   :  { %v81_v31 = vadd.f32 %v80_v30, %v79_v28 }
 0x142   :  { %143 = vpush %v81_v31 }
 0x143   :  { %145 = vpush %v107_v32 }
 0x173   :  { %s144_s1 = spop %143 }
 0x174   :  { %s146_s2 = spop %145  ;;  %v83_v39 = vstv %s144_s1 }
 0x175   :  { %v109_v33 = vstv %s146_s2 }
 0x176   :  { %153 = vrsqrt.f32 %v109_v33  ;;  %vm112_vm5 = vcmp.eq.f32.partialorder %v109_v33, inf  ;;  %v115_v36 = vand.u32 2147483648, %v109_v33  ;;  %vm114_vm6 = vcmp.eq.f32.partialorder %v109_v33, 0.0 }
 0x180   :  { %v154_v34 = vpop.eup %153 }
 0x181   :  { %v111_v35 = vmul.f32 %v154_v34, %v109_v33 }
 0x183   :  { %v113_v37 = vsel %vm112_vm5, %v109_v33, %v111_v35 }
 0x184   :  { %v116_v38 = vsel %vm114_vm6, %v115_v36, %v113_v37 }
 0x185   :  { %147 = vpush %v116_v38 }
 0x1b6   :  { %s148_s3 = spop %147 }
 0x1b7   :  { %s118_s25 = smul.f32 %s148_s3, %s232_s0 }
 0x1b9   :  { %v119_v40 = vstv %s118_s25 }
 0x1ba   :  { %v120_v41 = vadd.f32 %v119_v40, %v83_v39 }
 0x1bc   :  { %121 = vst [vmem:[#allocation4] sm:$0xff] %v120_v41 }
 0x1bd   :  { %166 = shalt.err (!%p163_p4)
}
 0x1be   :  { %s167_s5 = scalar_lea.hbm %s236_s4, 128 }
 0x1bf   :  { %p168_p5 = scmp.ne.s32.totalorder %s236_s4, %s167_s5  ;;  %p171_p6 = scmp.lt.u32.totalorder %s167_s5, %s236_s4 }
 0x1c1   :  { %p173_p7 = pnand %p171_p6, %p168_p5 }
 0x1c3   :  { %176 = shalt.err (!%p173_p7)
}
 0x1c4   :  { %131 = dma.vmem_to_hbm [thread:$0]  %s129_s27, 128, %s236_s4, [#allocation5]  }
 0x1c5   :  { %177 = dma.done.wait [#allocation5], 128  }
 0x1c6   :  { %178 = vsyncadd [#allocation5], 4294967168 }
 0x1c7   :  { %135 = vsyncpa [#allocation5], 1 }

</bundles_post_ra>
